<compile_context>
chip_gen: v5e
topology: v5e:2x2
jax: 0.10.0
libtpu: 0.0.40
codegen_flags: <defaults>
</compile_context>

<pallas_src>
import functools
import math

import jax
import jax.numpy as jnp
from jax.experimental import pallas as pl
from jax.experimental.pallas import tpu as pltpu

LANE = 128  # TPU lane width; channel dims are zero-padded to a multiple of this.


# --------------------------------------------------------------------------- #
# Pallas kernel: one GCNConv layer (row-block tiled), optional ReLU / log_softmax
# --------------------------------------------------------------------------- #
def _gcn_conv_kernel(a_ref, x_ref, w_ref, b_ref, out_ref, *, apply_relu, softmax_cols):
    # a_ref: (TM, N)      bf16 row block of normalized adjacency (streamed)
    # x_ref: (N, C_in)    bf16 node features (resident across row blocks)
    # w_ref: (C_in, C_out) bf16 weights (resident), b_ref: (1, C_out) f32
    # Dominant MXU work: (TM, N) x (N, C_in) with K = N, bf16 in / f32 accumulation.
    ax = jnp.dot(a_ref[...], x_ref[...], preferred_element_type=jnp.float32)
    # Tiny feature projection, amortized per row block (bf16 in / f32 acc).
    z = jnp.dot(ax.astype(jnp.bfloat16), w_ref[...],
                preferred_element_type=jnp.float32) + b_ref[...]
    if apply_relu:
        z = jnp.maximum(z, 0.0)
    if softmax_cols is not None:
        # Masked, numerically stable log_softmax over the first `softmax_cols`
        # (real) class columns; padded lanes are ignored. exp/log run on the EUP.
        col = jax.lax.broadcasted_iota(jnp.int32, z.shape, 1)
        valid = col < softmax_cols
        m = jnp.max(jnp.where(valid, z, -jnp.inf), axis=1, keepdims=True)
        e = jnp.where(valid, jnp.exp(z - m), 0.0)
        z = z - m - jnp.log(jnp.sum(e, axis=1, keepdims=True))
    out_ref[...] = z.astype(out_ref.dtype)


def _pick_row_tile(n, cap):
    """Largest multiple of 8 <= min(cap, n) that divides n (falls back to n)."""
    t = min(cap, n)
    t -= t % 8
    while t >= 8:
        if n % t == 0:
            return t
        t -= 8
    return n


def gcn_conv(a_norm, x_pad, w_pad, b_pad, *, relu, softmax_cols=None, row_tile=512):
    """One GCNConv layer: A_hat @ (X @ W) + b (computed as (A@X)@W), fused epilogue."""
    n = a_norm.shape[0]
    c_in = x_pad.shape[1]
    c_out = w_pad.shape[1]
    tm = _pick_row_tile(n, row_tile)
    grid = (n // tm,)

    # bf16 operands for the MXU / to halve the dominant A_hat HBM stream.
    a_bf = a_norm.astype(jnp.bfloat16)
    x_bf = x_pad.astype(jnp.bfloat16)
    w_bf = w_pad.astype(jnp.bfloat16)

    kernel = functools.partial(_gcn_conv_kernel, apply_relu=relu,
                               softmax_cols=softmax_cols)

    flops = 2 * n * n * c_in + 2 * n * c_in * c_out
    transcendentals = n * c_out if softmax_cols is not None else 0
    bytes_accessed = (a_bf.size * 2 + x_bf.size * 2 + w_bf.size * 2
                      + b_pad.size * 4 + n * c_out * 4)

    # Double-buffered A row block + resident X/W/b + double-buffered output, plus slack.
    vmem_bytes = (2 * tm * n * 2 + n * c_in * 2 + c_in * c_out * 2
                  + c_out * 4 + 2 * tm * c_out * 4)
    vmem_limit = int(min(48 * 2**20, max(16 * 2**20, 4 * vmem_bytes)))

    return pl.pallas_call(
        kernel,
        out_shape=jax.ShapeDtypeStruct((n, c_out), jnp.float32),
        grid=grid,
        in_specs=[
            pl.BlockSpec((tm, n), lambda i: (i, 0)),        # A_hat row block (streamed)
            pl.BlockSpec((n, c_in), lambda i: (0, 0)),      # X resident
            pl.BlockSpec((c_in, c_out), lambda i: (0, 0)),  # W resident
            pl.BlockSpec((1, c_out), lambda i: (0, 0)),     # bias resident
        ],
        out_specs=pl.BlockSpec((tm, c_out), lambda i: (i, 0)),  # lane-dense (128-wide)
        compiler_params=pltpu.CompilerParams(
            dimension_semantics=("parallel",),   # independent row blocks (v7x 2 TCs)
            vmem_limit_bytes=vmem_limit),
        cost_estimate=pl.CostEstimate(
            flops=flops, transcendentals=transcendentals,
            bytes_accessed=bytes_accessed),
    )(a_bf, x_bf, w_bf, b_pad)


def gcn_conv_reference(a_norm, x_pad, w_pad, b_pad, *, relu, softmax_cols=None):
    """Pure-JAX reference using the exact same math / quantization as the kernel."""
    ax = jnp.dot(a_norm.astype(jnp.bfloat16), x_pad.astype(jnp.bfloat16),
                 preferred_element_type=jnp.float32)
    z = jnp.dot(ax.astype(jnp.bfloat16), w_pad.astype(jnp.bfloat16),
                preferred_element_type=jnp.float32) + b_pad
    if relu:
        z = jnp.maximum(z, 0.0)
    if softmax_cols is not None:
        col = jnp.arange(z.shape[1])[None, :]
        valid = col < softmax_cols
        m = jnp.max(jnp.where(valid, z, -jnp.inf), axis=1, keepdims=True)
        e = jnp.where(valid, jnp.exp(z - m), 0.0)
        z = z - m - jnp.log(jnp.sum(e, axis=1, keepdims=True))
    return z


# --------------------------------------------------------------------------- #
# Dense-graph glue (data prep / pooling): plain JAX
# --------------------------------------------------------------------------- #
def _round_up(v, m=LANE):
    return ((v + m - 1) // m) * m


def _pad2d(mat, rows, cols):
    return jnp.zeros((rows, cols), mat.dtype).at[:mat.shape[0], :mat.shape[1]].set(mat)


def build_dense_adjacency(edge_index, num_nodes):
    """Dense unweighted adjacency (message flow source -> target)."""
    src, dst = edge_index[0], edge_index[1]
    return jnp.zeros((num_nodes, num_nodes), jnp.float32).at[dst, src].set(1.0)


def gcn_norm_dense(a):
    """GCN normalization: add remaining self loops, D^-1/2 A D^-1/2."""
    n = a.shape[0]
    eye = jnp.eye(n, dtype=a.dtype)
    diag = jnp.diagonal(a)
    a = a * (1.0 - eye) + jnp.diag(jnp.where(diag > 0, diag, 1.0))
    deg = jnp.sum(a, axis=1)
    d_inv_sqrt = jnp.where(deg > 0, jax.lax.rsqrt(deg), 0.0)
    return d_inv_sqrt[:, None] * a * d_inv_sqrt[None, :]


def augment_adj(a):
    """Dense analog of GraphUNet.augment_adj: ((A\\diag)+I)^2 with diag removed."""
    n = a.shape[0]
    eye = jnp.eye(n, dtype=a.dtype)
    a1 = a * (1.0 - eye) + eye
    a2 = a1 @ a1
    return a2 * (1.0 - eye)


def topk_pool(x, a, p_pad, ratio):
    """TopKPooling (multiplier=1, nonlinearity=tanh) on dense adjacency."""
    n = x.shape[0]
    k = max(1, int(math.ceil(ratio * n)))
    score = jnp.tanh((x @ p_pad) / jnp.linalg.norm(p_pad))
    _, perm = jax.lax.top_k(score, k)
    x_p = x[perm] * score[perm][:, None]
    a_p = a[perm][:, perm]
    return x_p, a_p, perm


# --------------------------------------------------------------------------- #
# Full GraphUNet forward (depth levels of pool / unpool around Pallas GCN convs)
# --------------------------------------------------------------------------- #
def graph_unet_forward(x, edge_index, params, *, depth, out_c, pool_ratio=0.5,
                       row_tile=512, use_pallas=True):
    if use_pallas:
        conv = functools.partial(gcn_conv, row_tile=row_tile)
    else:
        conv = gcn_conv_reference

    n = x.shape[0]
    a = build_dense_adjacency(edge_index, n)
    x = _pad2d(x.astype(jnp.float32), n, _round_up(x.shape[1]))

    # F.dropout(x) is identity in eval mode.

    # ---- down path -------------------------------------------------------- #
    x = conv(gcn_norm_dense(a), x, params["down_w"][0], params["down_b"][0], relu=True)
    xs, adjs, perms = [x], [a], []
    for i in range(1, depth + 1):
        a = augment_adj(a)
        x, a, perm = topk_pool(x, a, params["pool_p"][i - 1], pool_ratio)
        x = conv(gcn_norm_dense(a), x, params["down_w"][i], params["down_b"][i],
                 relu=True)
        if i < depth:
            xs.append(x)
            adjs.append(a)
        perms.append(perm)

    # ---- up path ----------------------------------------------------------- #
    for i in range(depth):
        j = depth - 1 - i
        res, a_j, perm = xs[j], adjs[j], perms[j]
        x = res + jnp.zeros_like(res).at[perm].set(x)        # unpool + skip (sum_res)
        last = (i == depth - 1)
        x = conv(gcn_norm_dense(a_j), x, params["up_w"][i], params["up_b"][i],
                 relu=not last, softmax_cols=out_c if last else None)

    return x[:, :out_c]   # drop zero-padded lanes


# --------------------------------------------------------------------------- #
# Parameter init (GCNConv weights/biases + TopK pooling score vectors), padded
# --------------------------------------------------------------------------- #
def glorot(key, shape):
    fan_in, fan_out = shape
    limit = (6.0 / (fan_in + fan_out)) ** 0.5
    return jax.random.uniform(key, shape, jnp.float32, -limit, limit)


def init_params(key, in_c, hid_c, out_c, depth):
    keys = list(jax.random.split(key, (depth + 1) + depth + depth))
    down_w, down_b, up_w, up_b, pool_p = [], [], [], [], []

    for dims in [(in_c, hid_c)] + [(hid_c, hid_c)] * depth:
        w = glorot(keys.pop(), dims)
        down_w.append(_pad2d(w, _round_up(dims[0]), _round_up(dims[1])))
        down_b.append(jnp.zeros((1, _round_up(dims[1])), jnp.float32))

    for dims in [(hid_c, hid_c)] * (depth - 1) + [(hid_c, out_c)]:
        w = glorot(keys.pop(), dims)
        up_w.append(_pad2d(w, _round_up(dims[0]), _round_up(dims[1])))
        up_b.append(jnp.zeros((1, _round_up(dims[1])), jnp.float32))

    for _ in range(depth):
        p = jax.random.uniform(keys.pop(), (hid_c,), jnp.float32, -1.0, 1.0)
        p = p / (hid_c ** 0.5)
        pool_p.append(jnp.zeros((_round_up(hid_c),), jnp.float32).at[:hid_c].set(p))

    return {"down_w": down_w, "down_b": down_b,
            "up_w": up_w, "up_b": up_b, "pool_p": pool_p}


# --------------------------------------------------------------------------- #
if __name__ == "__main__":
    # Small deterministic synthetic graph (eval-mode forward).
    N, IN_C, HID_C, OUT_C, DEPTH, E = 64, 16, 64, 8, 3, 256

    key = jax.random.PRNGKey(0)
    kx, ke, kp = jax.random.split(key, 3)

    x = jax.random.normal(kx, (N, IN_C), dtype=jnp.float32)
    edge_index = jax.random.randint(ke, (2, E), 0, N, dtype=jnp.int32)
    params = init_params(kp, IN_C, HID_C, OUT_C, DEPTH)

    # row_tile=32 keeps multiple row blocks in flight even at this toy node count.
    fwd_pallas = jax.jit(functools.partial(
        graph_unet_forward, depth=DEPTH, out_c=OUT_C, row_tile=32, use_pallas=True))
    fwd_ref = functools.partial(
        graph_unet_forward, depth=DEPTH, out_c=OUT_C, use_pallas=False)

    out = fwd_pallas(x, edge_index, params)
    jax.block_until_ready(out)

    ref = fwd_ref(x, edge_index, params)

    assert out.shape == (N, OUT_C)
    assert bool(jnp.all(jnp.isfinite(out)))
    assert bool(jnp.allclose(out, ref, atol=2e-2, rtol=2e-2))

    print("KERNEL_OK")
</pallas_src>

<mosaic_0001>
module attributes {stable_mosaic.version = 11 : i64} {
  func.func @_gcn_conv_kernel(%arg0: i32, %arg1: memref<32x64xbf16, #tpu.memory_space<vmem>>, %arg2: memref<64x128xbf16, #tpu.memory_space<vmem>>, %arg3: memref<128x128xbf16, #tpu.memory_space<vmem>>, %arg4: memref<1x128xf32, #tpu.memory_space<vmem>>, %arg5: memref<32x128xf32, #tpu.memory_space<vmem>>) attributes {dimension_semantics = [#tpu.dimension_semantics<parallel>], iteration_bounds = array<i64: 2>, scalar_prefetch = 0 : i64, scratch_operands = 0 : i64, tpu.core_type = #tpu.core_type<tc>, window_params = [{transform_indices = @transform_0, window_bounds = array<i64: 32, 64>}, {pipeline_mode = #tpu.pipeline_mode<synchronous>, transform_indices = @transform_1, window_bounds = array<i64: 64, 128>}, {pipeline_mode = #tpu.pipeline_mode<synchronous>, transform_indices = @transform_2, window_bounds = array<i64: 128, 128>}, {pipeline_mode = #tpu.pipeline_mode<synchronous>, transform_indices = @transform_3, window_bounds = array<i64: 1, 128>}, {transform_indices = @transform_4, window_bounds = array<i64: 32, 128>}]} {
    %c0 = arith.constant 0 : index
    %c0_0 = arith.constant 0 : index
    %0 = vector.load %arg1[%c0, %c0_0] : memref<32x64xbf16, #tpu.memory_space<vmem>>, vector<32x64xbf16>
    %c0_1 = arith.constant 0 : index
    %c0_2 = arith.constant 0 : index
    %1 = vector.load %arg2[%c0_1, %c0_2] : memref<64x128xbf16, #tpu.memory_space<vmem>>, vector<64x128xbf16>
    %cst = arith.constant dense<0.000000e+00> : vector<32x128xf32>
    %2 = tpu.matmul %0, %1, %cst {dimension_numbers = #tpu.dot_dimension_numbers<[1], [0], [0], [1], [0, 0, 1, 1], [], []>} : vector<32x64xbf16>, vector<64x128xbf16>, vector<32x128xf32> -> vector<32x128xf32>
    %3 = arith.truncf %2 : vector<32x128xf32> to vector<32x128xbf16>
    %c0_3 = arith.constant 0 : index
    %c0_4 = arith.constant 0 : index
    %4 = vector.load %arg3[%c0_3, %c0_4] : memref<128x128xbf16, #tpu.memory_space<vmem>>, vector<128x128xbf16>
    %cst_5 = arith.constant dense<0.000000e+00> : vector<32x128xf32>
    %5 = tpu.matmul %3, %4, %cst_5 {dimension_numbers = #tpu.dot_dimension_numbers<[1], [0], [0], [1], [0, 0, 1, 1], [], []>} : vector<32x128xbf16>, vector<128x128xbf16>, vector<32x128xf32> -> vector<32x128xf32>
    %c0_6 = arith.constant 0 : index
    %c0_7 = arith.constant 0 : index
    %6 = vector.load %arg4[%c0_6, %c0_7] : memref<1x128xf32, #tpu.memory_space<vmem>>, vector<1x128xf32>
    %7 = vector.broadcast %6 : vector<1x128xf32> to vector<32x128xf32>
    %8 = arith.addf %5, %7 : vector<32x128xf32>
    %cst_8 = arith.constant 0.000000e+00 : f32
    %9 = vector.broadcast %cst_8 : f32 to vector<32x128xf32>
    %10 = arith.maximumf %8, %9 : vector<32x128xf32>
    %c0_9 = arith.constant 0 : index
    %c0_10 = arith.constant 0 : index
    %11 = vector.load %arg5[%c0_9, %c0_10] : memref<32x128xf32, #tpu.memory_space<vmem>>, vector<32x128xf32>
    tpu.vector_store %arg5[%c0_9, %c0_10], %10 {strides = array<i32>} : memref<32x128xf32, #tpu.memory_space<vmem>>, vector<32x128xf32>,
    return
  }
  func.func @transform_0(%arg0: i32) -> (i32, i32) {
    %c0_i32 = arith.constant 0 : i32
    %c0_i32_0 = arith.constant 0 : i32
    return %arg0, %c0_i32 : i32, i32
  }
  func.func @transform_1(%arg0: i32) -> (i32, i32) {
    %c0_i32 = arith.constant 0 : i32
    %c0_i32_0 = arith.constant 0 : i32
    %c0_i32_1 = arith.constant 0 : i32
    return %c0_i32, %c0_i32_0 : i32, i32
  }
  func.func @transform_2(%arg0: i32) -> (i32, i32) {
    %c0_i32 = arith.constant 0 : i32
    %c0_i32_0 = arith.constant 0 : i32
    %c0_i32_1 = arith.constant 0 : i32
    return %c0_i32, %c0_i32_0 : i32, i32
  }
  func.func @transform_3(%arg0: i32) -> (i32, i32) {
    %c0_i32 = arith.constant 0 : i32
    %c0_i32_0 = arith.constant 0 : i32
    %c0_i32_1 = arith.constant 0 : i32
    return %c0_i32, %c0_i32_0 : i32, i32
  }
  func.func @transform_4(%arg0: i32) -> (i32, i32) {
    %c0_i32 = arith.constant 0 : i32
    %c0_i32_0 = arith.constant 0 : i32
    return %arg0, %c0_i32 : i32, i32
  }
}

module attributes {stable_mosaic.version = 11 : i64} {
  func.func @_gcn_conv_kernel(%arg0: i32, %arg1: memref<32x32xbf16, #tpu.memory_space<vmem>>, %arg2: memref<32x128xbf16, #tpu.memory_space<vmem>>, %arg3: memref<128x128xbf16, #tpu.memory_space<vmem>>, %arg4: memref<1x128xf32, #tpu.memory_space<vmem>>, %arg5: memref<32x128xf32, #tpu.memory_space<vmem>>) attributes {dimension_semantics = [#tpu.dimension_semantics<parallel>], iteration_bounds = array<i64: 1>, scalar_prefetch = 0 : i64, scratch_operands = 0 : i64, tpu.core_type = #tpu.core_type<tc>, window_params = [{transform_indices = @transform_0, window_bounds = array<i64: 32, 32>}, {pipeline_mode = #tpu.pipeline_mode<synchronous>, transform_indices = @transform_1, window_bounds = array<i64: 32, 128>}, {pipeline_mode = #tpu.pipeline_mode<synchronous>, transform_indices = @transform_2, window_bounds = array<i64: 128, 128>}, {pipeline_mode = #tpu.pipeline_mode<synchronous>, transform_indices = @transform_3, window_bounds = array<i64: 1, 128>}, {transform_indices = @transform_4, window_bounds = array<i64: 32, 128>}]} {
    %c0 = arith.constant 0 : index
    %c0_0 = arith.constant 0 : index
    %0 = vector.load %arg1[%c0, %c0_0] : memref<32x32xbf16, #tpu.memory_space<vmem>>, vector<32x32xbf16>
    %c0_1 = arith.constant 0 : index
    %c0_2 = arith.constant 0 : index
    %1 = vector.load %arg2[%c0_1, %c0_2] : memref<32x128xbf16, #tpu.memory_space<vmem>>, vector<32x128xbf16>
    %cst = arith.constant dense<0.000000e+00> : vector<32x128xf32>
    %2 = tpu.matmul %0, %1, %cst {dimension_numbers = #tpu.dot_dimension_numbers<[1], [0], [0], [1], [0, 0, 1, 1], [], []>} : vector<32x32xbf16>, vector<32x128xbf16>, vector<32x128xf32> -> vector<32x128xf32>
    %3 = arith.truncf %2 : vector<32x128xf32> to vector<32x128xbf16>
    %c0_3 = arith.constant 0 : index
    %c0_4 = arith.constant 0 : index
    %4 = vector.load %arg3[%c0_3, %c0_4] : memref<128x128xbf16, #tpu.memory_space<vmem>>, vector<128x128xbf16>
    %cst_5 = arith.constant dense<0.000000e+00> : vector<32x128xf32>
    %5 = tpu.matmul %3, %4, %cst_5 {dimension_numbers = #tpu.dot_dimension_numbers<[1], [0], [0], [1], [0, 0, 1, 1], [], []>} : vector<32x128xbf16>, vector<128x128xbf16>, vector<32x128xf32> -> vector<32x128xf32>
    %c0_6 = arith.constant 0 : index
    %c0_7 = arith.constant 0 : index
    %6 = vector.load %arg4[%c0_6, %c0_7] : memref<1x128xf32, #tpu.memory_space<vmem>>, vector<1x128xf32>
    %7 = vector.broadcast %6 : vector<1x128xf32> to vector<32x128xf32>
    %8 = arith.addf %5, %7 : vector<32x128xf32>
    %cst_8 = arith.constant 0.000000e+00 : f32
    %9 = vector.broadcast %cst_8 : f32 to vector<32x128xf32>
    %10 = arith.maximumf %8, %9 : vector<32x128xf32>
    %c0_9 = arith.constant 0 : index
    %c0_10 = arith.constant 0 : index
    %11 = vector.load %arg5[%c0_9, %c0_10] : memref<32x128xf32, #tpu.memory_space<vmem>>, vector<32x128xf32>
    tpu.vector_store %arg5[%c0_9, %c0_10], %10 {strides = array<i32>} : memref<32x128xf32, #tpu.memory_space<vmem>>, vector<32x128xf32>,
    return
  }
  func.func @transform_0(%arg0: i32) -> (i32, i32) {
    %c0_i32 = arith.constant 0 : i32
    %c0_i32_0 = arith.constant 0 : i32
    return %arg0, %c0_i32 : i32, i32
  }
  func.func @transform_1(%arg0: i32) -> (i32, i32) {
    %c0_i32 = arith.constant 0 : i32
    %c0_i32_0 = arith.constant 0 : i32
    %c0_i32_1 = arith.constant 0 : i32
    return %c0_i32, %c0_i32_0 : i32, i32
  }
  func.func @transform_2(%arg0: i32) -> (i32, i32) {
    %c0_i32 = arith.constant 0 : i32
    %c0_i32_0 = arith.constant 0 : i32
    %c0_i32_1 = arith.constant 0 : i32
    return %c0_i32, %c0_i32_0 : i32, i32
  }
  func.func @transform_3(%arg0: i32) -> (i32, i32) {
    %c0_i32 = arith.constant 0 : i32
    %c0_i32_0 = arith.constant 0 : i32
    %c0_i32_1 = arith.constant 0 : i32
    return %c0_i32, %c0_i32_0 : i32, i32
  }
  func.func @transform_4(%arg0: i32) -> (i32, i32) {
    %c0_i32 = arith.constant 0 : i32
    %c0_i32_0 = arith.constant 0 : i32
    return %arg0, %c0_i32 : i32, i32
  }
}

module attributes {stable_mosaic.version = 11 : i64} {
  func.func @_gcn_conv_kernel(%arg0: i32, %arg1: memref<16x16xbf16, #tpu.memory_space<vmem>>, %arg2: memref<16x128xbf16, #tpu.memory_space<vmem>>, %arg3: memref<128x128xbf16, #tpu.memory_space<vmem>>, %arg4: memref<1x128xf32, #tpu.memory_space<vmem>>, %arg5: memref<16x128xf32, #tpu.memory_space<vmem>>) attributes {dimension_semantics = [#tpu.dimension_semantics<parallel>], iteration_bounds = array<i64: 1>, scalar_prefetch = 0 : i64, scratch_operands = 0 : i64, tpu.core_type = #tpu.core_type<tc>, window_params = [{transform_indices = @transform_0, window_bounds = array<i64: 16, 16>}, {pipeline_mode = #tpu.pipeline_mode<synchronous>, transform_indices = @transform_1, window_bounds = array<i64: 16, 128>}, {pipeline_mode = #tpu.pipeline_mode<synchronous>, transform_indices = @transform_2, window_bounds = array<i64: 128, 128>}, {pipeline_mode = #tpu.pipeline_mode<synchronous>, transform_indices = @transform_3, window_bounds = array<i64: 1, 128>}, {transform_indices = @transform_4, window_bounds = array<i64: 16, 128>}]} {
    %c0 = arith.constant 0 : index
    %c0_0 = arith.constant 0 : index
    %0 = vector.load %arg1[%c0, %c0_0] : memref<16x16xbf16, #tpu.memory_space<vmem>>, vector<16x16xbf16>
    %c0_1 = arith.constant 0 : index
    %c0_2 = arith.constant 0 : index
    %1 = vector.load %arg2[%c0_1, %c0_2] : memref<16x128xbf16, #tpu.memory_space<vmem>>, vector<16x128xbf16>
    %cst = arith.constant dense<0.000000e+00> : vector<16x128xf32>
    %2 = tpu.matmul %0, %1, %cst {dimension_numbers = #tpu.dot_dimension_numbers<[1], [0], [0], [1], [0, 0, 1, 1], [], []>} : vector<16x16xbf16>, vector<16x128xbf16>, vector<16x128xf32> -> vector<16x128xf32>
    %3 = arith.truncf %2 : vector<16x128xf32> to vector<16x128xbf16>
    %c0_3 = arith.constant 0 : index
    %c0_4 = arith.constant 0 : index
    %4 = vector.load %arg3[%c0_3, %c0_4] : memref<128x128xbf16, #tpu.memory_space<vmem>>, vector<128x128xbf16>
    %cst_5 = arith.constant dense<0.000000e+00> : vector<16x128xf32>
    %5 = tpu.matmul %3, %4, %cst_5 {dimension_numbers = #tpu.dot_dimension_numbers<[1], [0], [0], [1], [0, 0, 1, 1], [], []>} : vector<16x128xbf16>, vector<128x128xbf16>, vector<16x128xf32> -> vector<16x128xf32>
    %c0_6 = arith.constant 0 : index
    %c0_7 = arith.constant 0 : index
    %6 = vector.load %arg4[%c0_6, %c0_7] : memref<1x128xf32, #tpu.memory_space<vmem>>, vector<1x128xf32>
    %7 = vector.broadcast %6 : vector<1x128xf32> to vector<16x128xf32>
    %8 = arith.addf %5, %7 : vector<16x128xf32>
    %cst_8 = arith.constant 0.000000e+00 : f32
    %9 = vector.broadcast %cst_8 : f32 to vector<16x128xf32>
    %10 = arith.maximumf %8, %9 : vector<16x128xf32>
    %c0_9 = arith.constant 0 : index
    %c0_10 = arith.constant 0 : index
    %11 = vector.load %arg5[%c0_9, %c0_10] : memref<16x128xf32, #tpu.memory_space<vmem>>, vector<16x128xf32>
    tpu.vector_store %arg5[%c0_9, %c0_10], %10 {strides = array<i32>} : memref<16x128xf32, #tpu.memory_space<vmem>>, vector<16x128xf32>,
    return
  }
  func.func @transform_0(%arg0: i32) -> (i32, i32) {
    %c0_i32 = arith.constant 0 : i32
    %c0_i32_0 = arith.constant 0 : i32
    return %arg0, %c0_i32 : i32, i32
  }
  func.func @transform_1(%arg0: i32) -> (i32, i32) {
    %c0_i32 = arith.constant 0 : i32
    %c0_i32_0 = arith.constant 0 : i32
    %c0_i32_1 = arith.constant 0 : i32
    return %c0_i32, %c0_i32_0 : i32, i32
  }
  func.func @transform_2(%arg0: i32) -> (i32, i32) {
    %c0_i32 = arith.constant 0 : i32
    %c0_i32_0 = arith.constant 0 : i32
    %c0_i32_1 = arith.constant 0 : i32
    return %c0_i32, %c0_i32_0 : i32, i32
  }
  func.func @transform_3(%arg0: i32) -> (i32, i32) {
    %c0_i32 = arith.constant 0 : i32
    %c0_i32_0 = arith.constant 0 : i32
    %c0_i32_1 = arith.constant 0 : i32
    return %c0_i32, %c0_i32_0 : i32, i32
  }
  func.func @transform_4(%arg0: i32) -> (i32, i32) {
    %c0_i32 = arith.constant 0 : i32
    %c0_i32_0 = arith.constant 0 : i32
    return %arg0, %c0_i32 : i32, i32
  }
}

module attributes {stable_mosaic.version = 11 : i64} {
  func.func @_gcn_conv_kernel(%arg0: i32, %arg1: memref<8x8xbf16, #tpu.memory_space<vmem>>, %arg2: memref<8x128xbf16, #tpu.memory_space<vmem>>, %arg3: memref<128x128xbf16, #tpu.memory_space<vmem>>, %arg4: memref<1x128xf32, #tpu.memory_space<vmem>>, %arg5: memref<8x128xf32, #tpu.memory_space<vmem>>) attributes {dimension_semantics = [#tpu.dimension_semantics<parallel>], iteration_bounds = array<i64: 1>, scalar_prefetch = 0 : i64, scratch_operands = 0 : i64, tpu.core_type = #tpu.core_type<tc>, window_params = [{transform_indices = @transform_0, window_bounds = array<i64: 8, 8>}, {pipeline_mode = #tpu.pipeline_mode<synchronous>, transform_indices = @transform_1, window_bounds = array<i64: 8, 128>}, {pipeline_mode = #tpu.pipeline_mode<synchronous>, transform_indices = @transform_2, window_bounds = array<i64: 128, 128>}, {pipeline_mode = #tpu.pipeline_mode<synchronous>, transform_indices = @transform_3, window_bounds = array<i64: 1, 128>}, {transform_indices = @transform_4, window_bounds = array<i64: 8, 128>}]} {
    %c0 = arith.constant 0 : index
    %c0_0 = arith.constant 0 : index
    %0 = vector.load %arg1[%c0, %c0_0] : memref<8x8xbf16, #tpu.memory_space<vmem>>, vector<8x8xbf16>
    %c0_1 = arith.constant 0 : index
    %c0_2 = arith.constant 0 : index
    %1 = vector.load %arg2[%c0_1, %c0_2] : memref<8x128xbf16, #tpu.memory_space<vmem>>, vector<8x128xbf16>
    %cst = arith.constant dense<0.000000e+00> : vector<8x128xf32>
    %2 = tpu.matmul %0, %1, %cst {dimension_numbers = #tpu.dot_dimension_numbers<[1], [0], [0], [1], [0, 0, 1, 1], [], []>} : vector<8x8xbf16>, vector<8x128xbf16>, vector<8x128xf32> -> vector<8x128xf32>
    %3 = arith.truncf %2 : vector<8x128xf32> to vector<8x128xbf16>
    %c0_3 = arith.constant 0 : index
    %c0_4 = arith.constant 0 : index
    %4 = vector.load %arg3[%c0_3, %c0_4] : memref<128x128xbf16, #tpu.memory_space<vmem>>, vector<128x128xbf16>
    %cst_5 = arith.constant dense<0.000000e+00> : vector<8x128xf32>
    %5 = tpu.matmul %3, %4, %cst_5 {dimension_numbers = #tpu.dot_dimension_numbers<[1], [0], [0], [1], [0, 0, 1, 1], [], []>} : vector<8x128xbf16>, vector<128x128xbf16>, vector<8x128xf32> -> vector<8x128xf32>
    %c0_6 = arith.constant 0 : index
    %c0_7 = arith.constant 0 : index
    %6 = vector.load %arg4[%c0_6, %c0_7] : memref<1x128xf32, #tpu.memory_space<vmem>>, vector<1x128xf32>
    %7 = vector.broadcast %6 : vector<1x128xf32> to vector<8x128xf32>
    %8 = arith.addf %5, %7 : vector<8x128xf32>
    %cst_8 = arith.constant 0.000000e+00 : f32
    %9 = vector.broadcast %cst_8 : f32 to vector<8x128xf32>
    %10 = arith.maximumf %8, %9 : vector<8x128xf32>
    %c0_9 = arith.constant 0 : index
    %c0_10 = arith.constant 0 : index
    %11 = vector.load %arg5[%c0_9, %c0_10] : memref<8x128xf32, #tpu.memory_space<vmem>>, vector<8x128xf32>
    tpu.vector_store %arg5[%c0_9, %c0_10], %10 {strides = array<i32>} : memref<8x128xf32, #tpu.memory_space<vmem>>, vector<8x128xf32>,
    return
  }
  func.func @transform_0(%arg0: i32) -> (i32, i32) {
    %c0_i32 = arith.constant 0 : i32
    %c0_i32_0 = arith.constant 0 : i32
    return %arg0, %c0_i32 : i32, i32
  }
  func.func @transform_1(%arg0: i32) -> (i32, i32) {
    %c0_i32 = arith.constant 0 : i32
    %c0_i32_0 = arith.constant 0 : i32
    %c0_i32_1 = arith.constant 0 : i32
    return %c0_i32, %c0_i32_0 : i32, i32
  }
  func.func @transform_2(%arg0: i32) -> (i32, i32) {
    %c0_i32 = arith.constant 0 : i32
    %c0_i32_0 = arith.constant 0 : i32
    %c0_i32_1 = arith.constant 0 : i32
    return %c0_i32, %c0_i32_0 : i32, i32
  }
  func.func @transform_3(%arg0: i32) -> (i32, i32) {
    %c0_i32 = arith.constant 0 : i32
    %c0_i32_0 = arith.constant 0 : i32
    %c0_i32_1 = arith.constant 0 : i32
    return %c0_i32, %c0_i32_0 : i32, i32
  }
  func.func @transform_4(%arg0: i32) -> (i32, i32) {
    %c0_i32 = arith.constant 0 : i32
    %c0_i32_0 = arith.constant 0 : i32
    return %arg0, %c0_i32 : i32, i32
  }
}

module attributes {stable_mosaic.version = 11 : i64} {
  func.func @_gcn_conv_kernel(%arg0: i32, %arg1: memref<32x64xbf16, #tpu.memory_space<vmem>>, %arg2: memref<64x128xbf16, #tpu.memory_space<vmem>>, %arg3: memref<128x128xbf16, #tpu.memory_space<vmem>>, %arg4: memref<1x128xf32, #tpu.memory_space<vmem>>, %arg5: memref<32x128xf32, #tpu.memory_space<vmem>>) attributes {dimension_semantics = [#tpu.dimension_semantics<parallel>], iteration_bounds = array<i64: 2>, scalar_prefetch = 0 : i64, scratch_operands = 0 : i64, tpu.core_type = #tpu.core_type<tc>, window_params = [{transform_indices = @transform_0, window_bounds = array<i64: 32, 64>}, {pipeline_mode = #tpu.pipeline_mode<synchronous>, transform_indices = @transform_1, window_bounds = array<i64: 64, 128>}, {pipeline_mode = #tpu.pipeline_mode<synchronous>, transform_indices = @transform_2, window_bounds = array<i64: 128, 128>}, {pipeline_mode = #tpu.pipeline_mode<synchronous>, transform_indices = @transform_3, window_bounds = array<i64: 1, 128>}, {transform_indices = @transform_4, window_bounds = array<i64: 32, 128>}]} {
    %c0 = arith.constant 0 : index
    %c0_0 = arith.constant 0 : index
    %0 = vector.load %arg1[%c0, %c0_0] : memref<32x64xbf16, #tpu.memory_space<vmem>>, vector<32x64xbf16>
    %c0_1 = arith.constant 0 : index
    %c0_2 = arith.constant 0 : index
    %1 = vector.load %arg2[%c0_1, %c0_2] : memref<64x128xbf16, #tpu.memory_space<vmem>>, vector<64x128xbf16>
    %cst = arith.constant dense<0.000000e+00> : vector<32x128xf32>
    %2 = tpu.matmul %0, %1, %cst {dimension_numbers = #tpu.dot_dimension_numbers<[1], [0], [0], [1], [0, 0, 1, 1], [], []>} : vector<32x64xbf16>, vector<64x128xbf16>, vector<32x128xf32> -> vector<32x128xf32>
    %3 = arith.truncf %2 : vector<32x128xf32> to vector<32x128xbf16>
    %c0_3 = arith.constant 0 : index
    %c0_4 = arith.constant 0 : index
    %4 = vector.load %arg3[%c0_3, %c0_4] : memref<128x128xbf16, #tpu.memory_space<vmem>>, vector<128x128xbf16>
    %cst_5 = arith.constant dense<0.000000e+00> : vector<32x128xf32>
    %5 = tpu.matmul %3, %4, %cst_5 {dimension_numbers = #tpu.dot_dimension_numbers<[1], [0], [0], [1], [0, 0, 1, 1], [], []>} : vector<32x128xbf16>, vector<128x128xbf16>, vector<32x128xf32> -> vector<32x128xf32>
    %c0_6 = arith.constant 0 : index
    %c0_7 = arith.constant 0 : index
    %6 = vector.load %arg4[%c0_6, %c0_7] : memref<1x128xf32, #tpu.memory_space<vmem>>, vector<1x128xf32>
    %7 = vector.broadcast %6 : vector<1x128xf32> to vector<32x128xf32>
    %8 = arith.addf %5, %7 : vector<32x128xf32>
    %9 = tpu.iota {dimensions = array<i32: 1>} : vector<32x128xi32>
    %c8_i32 = arith.constant 8 : i32
    %10 = vector.broadcast %c8_i32 : i32 to vector<32x128xi32>
    %11 = arith.cmpi slt, %9, %10 : vector<32x128xi32>
    %cst_8 = arith.constant 0xFF800000 : f32
    %12 = vector.broadcast %cst_8 : f32 to vector<32x128xf32>
    %13 = arith.select %11, %8, %12 : vector<32x128xi1>, vector<32x128xf32>
    %cst_9 = arith.constant dense<0xFF800000> : vector<32xf32>
    %14 = vector.multi_reduction <maximumf>, %13, %cst_9 [1] : vector<32x128xf32> to vector<32xf32>
    %15 = vector.shape_cast %14 : vector<32xf32> to vector<32x1xf32>
    %16 = vector.broadcast %15 : vector<32x1xf32> to vector<32x128xf32>
    %17 = arith.subf %8, %16 : vector<32x128xf32>
    %18 = math.exp %17 : vector<32x128xf32>
    %cst_10 = arith.constant 0.000000e+00 : f32
    %19 = vector.broadcast %cst_10 : f32 to vector<32x128xf32>
    %20 = arith.select %11, %18, %19 : vector<32x128xi1>, vector<32x128xf32>
    %21 = vector.broadcast %15 : vector<32x1xf32> to vector<32x128xf32>
    %22 = arith.subf %8, %21 : vector<32x128xf32>
    %cst_11 = arith.constant dense<0.000000e+00> : vector<32xf32>
    %23 = vector.multi_reduction <add>, %20, %cst_11 [1] : vector<32x128xf32> to vector<32xf32>
    %24 = vector.shape_cast %23 : vector<32xf32> to vector<32x1xf32>
    %25 = math.log %24 : vector<32x1xf32>
    %26 = vector.broadcast %25 : vector<32x1xf32> to vector<32x128xf32>
    %27 = arith.subf %22, %26 : vector<32x128xf32>
    %c0_12 = arith.constant 0 : index
    %c0_13 = arith.constant 0 : index
    %28 = vector.load %arg5[%c0_12, %c0_13] : memref<32x128xf32, #tpu.memory_space<vmem>>, vector<32x128xf32>
    tpu.vector_store %arg5[%c0_12, %c0_13], %27 {strides = array<i32>} : memref<32x128xf32, #tpu.memory_space<vmem>>, vector<32x128xf32>,
    return
  }
  func.func @transform_0(%arg0: i32) -> (i32, i32) {
    %c0_i32 = arith.constant 0 : i32
    %c0_i32_0 = arith.constant 0 : i32
    return %arg0, %c0_i32 : i32, i32
  }
  func.func @transform_1(%arg0: i32) -> (i32, i32) {
    %c0_i32 = arith.constant 0 : i32
    %c0_i32_0 = arith.constant 0 : i32
    %c0_i32_1 = arith.constant 0 : i32
    return %c0_i32, %c0_i32_0 : i32, i32
  }
  func.func @transform_2(%arg0: i32) -> (i32, i32) {
    %c0_i32 = arith.constant 0 : i32
    %c0_i32_0 = arith.constant 0 : i32
    %c0_i32_1 = arith.constant 0 : i32
    return %c0_i32, %c0_i32_0 : i32, i32
  }
  func.func @transform_3(%arg0: i32) -> (i32, i32) {
    %c0_i32 = arith.constant 0 : i32
    %c0_i32_0 = arith.constant 0 : i32
    %c0_i32_1 = arith.constant 0 : i32
    return %c0_i32, %c0_i32_0 : i32, i32
  }
  func.func @transform_4(%arg0: i32) -> (i32, i32) {
    %c0_i32 = arith.constant 0 : i32
    %c0_i32_0 = arith.constant 0 : i32
    return %arg0, %c0_i32 : i32, i32
  }
}

</mosaic_0001>

<bundles_post_ra>
// kernel: graph_unet_forward.8
= control target key start
LH: loop header
LB: loop body
LE: loop exit
PB: predicated region body
PF: predicated region fallthrough
CT: control target
= control target key end

     0   :  { %vm48_vm0 = vcmask 261120   ;;  %s322_s1 = inlined_call_operand.vmem [shape: bf16[32,128], index: 1, kind: input, shape index: {}]   ;;  %s323_s2 = inlined_call_operand.vmem [shape: bf16[128,128], index: 2, kind: input, shape index: {}]   ;;  %s324_s0 = inlined_call_operand.vmem [shape: bf16[32,32], index: 0, kind: input, shape index: {}]   ;;  %s325_s3 = inlined_call_operand.vmem [shape: f32[1,128], index: 3, kind: input, shape index: {}]   ;;  %s326_s4 = inlined_call_operand.vmem [shape: f32[32,128], index: 4, kind: output, shape index: {}]  }
   0x1   :  { %v228_v0 = vld [vmem:[%s322_s1 + $0x8] sm:$0xff]  ;;  %v236_v1 = vld [vmem:[%s323_s2 + $0x38] sm:$0xff]  ;;  %v227_v2 = vld [vmem:[%s322_s1] sm:$0xff] }
   0x2   :  { %61 = vmatpush.bf16.msra.mxu0 %v228_v0  ;;  %144 = vmatpush.bf16.msra.mxu1 %v236_v1  ;;  %v235_v3 = vld [vmem:[%s323_s2 + $0x30] sm:$0xff]  ;;  %v225_v4 = vld [vmem:[%s324_s0] sm:$0xff]  ;;  %v234_v5 = vld [vmem:[%s323_s2 + $0x28] sm:$0xff] }
   0x3   :  { %237 = vmatpush.bf16.msra.mxu2 %v236_v1  ;;  %v233_v6 = vld [vmem:[%s323_s2 + $0x20] sm:$0xff]  ;;  %v232_v7 = vld [vmem:[%s323_s2 + $0x18] sm:$0xff]  ;;  %v226_v8 = vld [vmem:[%s324_s0 + $0x8] sm:$0xff] }
   0x4   :  { %v231_v9 = vld [vmem:[%s323_s2 + $0x10] sm:$0xff]  ;;  %v230_v10 = vld [vmem:[%s323_s2 + $0x8] sm:$0xff]  ;;  %v229_v11 = vld [vmem:[%s323_s2] sm:$0xff] }
   0x5   :  { %v245_v18 = vld [vmem:[%s325_s3] ss:$0 sm:$0xff] }
   0x6   :  { %62 = vmatpush.bf16.msra.mxu0 %v227_v2  ;;  %145 = vmatpush.bf16.msra.mxu1 %v235_v3 }
   0x7   :  { %238 = vmatpush.bf16.msra.mxu2 %v235_v3 }
   0x9   :  { %191 = vmatmul.msk.bf16.vlgmr.msra.gmra.mxu0 %vm48_vm0, %v225_v4 }
   0xa   :  { %146 = vmatpush.bf16.msra.mxu1 %v234_v5 }
   0xb   :  { %239 = vmatpush.bf16.msra.mxu2 %v234_v5 }
   0xe   :  { %147 = vmatpush.bf16.msra.mxu1 %v233_v6 }
   0xf   :  { %240 = vmatpush.bf16.msra.mxu2 %v233_v6 }
  0x12   :  { %148 = vmatpush.bf16.msra.mxu1 %v232_v7 }
  0x13   :  { %241 = vmatpush.bf16.msra.mxu2 %v232_v7 }
  0x16   :  { %149 = vmatpush.bf16.msra.mxu1 %v231_v9 }
  0x17   :  { %242 = vmatpush.bf16.msra.mxu2 %v231_v9 }
  0x19   :  { %192 = vmatmul.msk.bf16.gmra.mxu0 %vm48_vm0, %v226_v8 }
  0x1a   :  { %150 = vmatpush.bf16.msra.mxu1 %v230_v10 }
  0x1b   :  { %243 = vmatpush.bf16.msra.mxu2 %v230_v10 }
  0x1e   :  { %151 = vmatpush.bf16.msra.mxu1 %v229_v11 }
  0x1f   :  { %244 = vmatpush.bf16.msra.mxu2 %v229_v11 }
  0x86   :  { %v64_v12 = vpop.f32.mrf.mxu0 }
  0x8e   :  { %v66_v13 = vpop.f32.mrf.mxu0 }
  0x8f   :  { %v74_v14 = vpack.c.bf16 %v66_v13, %v64_v12 }
  0x91   :  { %152 = vmatmul.bf16.vlgmr.msra.gmra.mxu1 %v74_v14 }
  0x96   :  { %v69_v15 = vpop.f32.mrf.mxu0 }
  0x9e   :  { %v71_v16 = vpop.f32.mrf.mxu0 }
  0x9f   :  { %v75_v17 = vpack.c.bf16 %v71_v16, %v69_v15 }
  0xa1   :  { %157 = vmatmul.bf16.vlgmr.msra.gmra.mxu2 %v75_v17 }
 0x10e   :  { %v153_v19 = vpop.f32.mrf.mxu1 }
 0x10f   :  { %v154_v20 = vadd.f32 %v245_v18, %v153_v19 }
 0x111   :  { %v163_v21 = vmax.f32 %v154_v20, 0.0 }
 0x113   :  { %167 = vst [vmem:[%s326_s4] sm:$0xff] %v163_v21 }
 0x116   :  { %v155_v22 = vpop.f32.mrf.mxu1 }
 0x117   :  { %v156_v23 = vadd.f32 %v245_v18, %v155_v22 }
 0x119   :  { %v164_v24 = vmax.f32 %v156_v23, 0.0 }
 0x11b   :  { %168 = vst [vmem:[%s326_s4 + $0x8] sm:$0xff] %v164_v24 }
 0x124   :  { %v158_v25 = vpop.f32.mrf.mxu2 }
 0x125   :  { %v159_v26 = vadd.f32 %v245_v18, %v158_v25 }
 0x127   :  { %v165_v27 = vmax.f32 %v159_v26, 0.0 }
 0x129   :  { %169 = vst [vmem:[%s326_s4 + $0x10] sm:$0xff] %v165_v27 }
 0x12c   :  { %v160_v28 = vpop.f32.mrf.mxu2 }
 0x12d   :  { %v161_v29 = vadd.f32 %v245_v18, %v160_v28 }
 0x12f   :  { %v166_v30 = vmax.f32 %v161_v29, 0.0 }
 0x131   :  { %170 = vst [vmem:[%s326_s4 + $0x18] sm:$0xff] %v166_v30 }

// kernel: graph_unet_forward.7
= control target key start
LH: loop header
LB: loop body
LE: loop exit
PB: predicated region body
PF: predicated region fallthrough
CT: control target
= control target key end

     0   :  { %s564_s15 = smov 0   ;;  %s624_s0 = inlined_call_operand.vmem [shape: bf16[64,64], index: 0, kind: input, shape index: {}]   ;;  %s625_s1 = inlined_call_operand.vmem [shape: bf16[64,128], index: 1, kind: input, shape index: {}]   ;;  %s626_s2 = inlined_call_operand.vmem [shape: bf16[128,128], index: 2, kind: input, shape index: {}]   ;;  %s627_s3 = inlined_call_operand.vmem [shape: f32[1,128], index: 3, kind: input, shape index: {}]   ;;  %s628_s4 = inlined_call_operand.vmem [shape: f32[64,128], index: 4, kind: output, shape index: {}]  }
   0x1 LB: > { %s427_s16 = sadd.s32 4294967295, %s537_s15   ;;  %p431_p0 = scmp.ge.s32.totalorder %s537_s15, 1  ;;  %s537_s15 = sphi %s564_s15, %s14_s15  }
   0x2   : > { %p163_p1 = scmp.lt.s32.totalorder %s537_s15, 3 }
   0x4   : > { %p164_p2 = pnand %p431_p0, %p163_p1 }
   0x5   : > { %s432_s19 = sshll.u32 (!%p164_p2), %s427_s16, 2 }
   0x6   : > { %167 = sbr.rel (%p164_p2) target bundleno = 314 (0x13a), region = 36  ;;  %p190_p3 = scmp.lt.s32.totalorder (!%p164_p2), %s432_s19, 7 }
   0xb   : > { %v501_v0 = vld [vmem:[%s625_s1 + $0x18] sm:$0xff]  ;;  %v500_v2 = vld [vmem:[%s625_s1 + $0x10] sm:$0xff]  ;;  %s630_s19 = smov (!%p190_p3, %s432_s19), 7  ;;  %v499_v4 = vld [vmem:[%s625_s1 + $0x8] sm:$0xff]  ;;  %vm248_vm0 = vcmask 523264  }
   0xc   : > { %v509_v1 = vld [vmem:[%s626_s2 + $0x38] sm:$0xff]  ;;  %259 = vmatpush.bf16.msra.mxu0 %v501_v0  ;;  %510 = vmatpush.bf16.msra.mxu3 %v501_v0  ;;  %v508_v3 = vld [vmem:[%s626_s2 + $0x30] sm:$0xff]  ;;  %s433_s28 = sshll.u32 %s630_s19, 2  ;;  %v507_v5 = vld [vmem:[%s626_s2 + $0x28] sm:$0xff]  ;;  %s435_s24 = sshll.u32 %s630_s19, 3 }
   0xd   : > { %344 = vmatpush.bf16.msra.mxu1 %v509_v1  ;;  %514 = vmatpush.bf16.msra.mxu2 %v509_v1  ;;  %v498_v6 = vld [vmem:[%s625_s1] sm:$0xff]  ;;  %s193_s9 = scalar_lea.vmem %s624_s0, %s433_s28  ;;  %v505_v10 = vld [vmem:[%s626_s2 + $0x18] sm:$0xff]  ;;  %v504_v11 = vld [vmem:[%s626_s2 + $0x10] sm:$0xff]  ;;  %s199_s27 = scalar_lea.vmem %s628_s4, %s435_s24 }
   0xe   : > { %v506_v7 = vld [vmem:[%s626_s2 + $0x20] sm:$0xff]  ;;  %v497_v9 = vld [vmem:[%s193_s9 + $0x8] sm:$0xff] }
   0xf   : > { %v496_v8 = vld [vmem:[%s193_s9] sm:$0xff]  ;;  %v503_v12 = vld [vmem:[%s626_s2 + $0x8] sm:$0xff] }
  0x10   : > { %260 = vmatpush.bf16.msra.mxu0 %v500_v2  ;;  %511 = vmatpush.bf16.msra.mxu3 %v500_v2  ;;  %v502_v13 = vld [vmem:[%s626_s2] sm:$0xff] }
  0x11   : > { %345 = vmatpush.bf16.msra.mxu1 %v508_v3  ;;  %515 = vmatpush.bf16.msra.mxu2 %v508_v3  ;;  %v530_v20 = vld [vmem:[%s627_s3] ss:$0 sm:$0xff] }
  0x14   : > { %261 = vmatpush.bf16.msra.mxu0 %v499_v4  ;;  %512 = vmatpush.bf16.msra.mxu3 %v499_v4 }
  0x15   : > { %346 = vmatpush.bf16.msra.mxu1 %v507_v5  ;;  %516 = vmatpush.bf16.msra.mxu2 %v507_v5 }
  0x18   : > { %262 = vmatpush.bf16.msra.mxu0 %v498_v6  ;;  %513 = vmatpush.bf16.msra.mxu3 %v498_v6 }
  0x19   : > { %347 = vmatpush.bf16.msra.mxu1 %v506_v7  ;;  %517 = vmatpush.bf16.msra.mxu2 %v506_v7 }
  0x1b   : > { %460 = vmatmul.msk.bf16.vlgmr.msra.gmra.mxu0 %vm248_vm0, %v496_v8  ;;  %461 = vmatmul.msk.bf16.vlgmr.msra.gmra.mxu3 %vm248_vm0, %v497_v9 }
  0x1d   : > { %348 = vmatpush.bf16.msra.mxu1 %v505_v10  ;;  %518 = vmatpush.bf16.msra.mxu2 %v505_v10 }
  0x21   : > { %349 = vmatpush.bf16.msra.mxu1 %v504_v11  ;;  %519 = vmatpush.bf16.msra.mxu2 %v504_v11 }
  0x25   : > { %350 = vmatpush.bf16.msra.mxu1 %v503_v12  ;;  %520 = vmatpush.bf16.msra.mxu2 %v503_v12 }
  0x29   : > { %351 = vmatpush.bf16.msra.mxu1 %v502_v13  ;;  %521 = vmatpush.bf16.msra.mxu2 %v502_v13 }
  0x98   : > { %v264_v14 = vpop.f32.mrf.mxu0 }
  0x9e   : > { %v269_v15 = vpop.f32.mrf.mxu3 }
  0xa0   : > { %v266_v16 = vpop.f32.mrf.mxu0 }
  0xa1   : > { %v274_v17 = vpack.c.bf16 %v266_v16, %v264_v14 }
  0xa3   : > { %352 = vmatmul.bf16.vlgmr.msra.gmra.mxu1 %v274_v17 }
  0xa6   : > { %v271_v18 = vpop.f32.mrf.mxu3 }
  0xa7   : > { %v275_v19 = vpack.c.bf16 %v271_v18, %v269_v15 }
  0xa9   : > { %357 = vmatmul.bf16.vlgmr.msra.gmra.mxu2 %v275_v19 }
 0x120   : > { %v353_v21 = vpop.f32.mrf.mxu1 }
 0x121   : > { %v354_v22 = vadd.f32 %v530_v20, %v353_v21 }
 0x123   : > { %v363_v23 = vmax.f32 %v354_v22, 0.0 }
 0x125   : > { %367 = vst [vmem:[%s199_s27] sm:$0xff] %v363_v23 }
 0x128   : > { %v355_v24 = vpop.f32.mrf.mxu1 }
 0x129   : > { %v356_v25 = vadd.f32 %v530_v20, %v355_v24 }
 0x12b   : > { %v364_v26 = vmax.f32 %v356_v25, 0.0 }
 0x12c   : > { %v358_v27 = vpop.f32.mrf.mxu2 }
 0x12d   : > { %368 = vst [vmem:[%s199_s27 + $0x8] sm:$0xff] %v364_v26  ;;  %v359_v28 = vadd.f32 %v530_v20, %v358_v27 }
 0x12f   : > { %v365_v29 = vmax.f32 %v359_v28, 0.0 }
 0x131   : > { %369 = vst [vmem:[%s199_s27 + $0x10] sm:$0xff] %v365_v29 }
 0x134   : > { %v360_v30 = vpop.f32.mrf.mxu2 }
 0x135   : > { %v361_v31 = vadd.f32 %v530_v20, %v360_v30 }
 0x137   : > { %v366_v32 = vmax.f32 %v361_v31, 0.0 }
 0x139   : > { %370 = vst [vmem:[%s199_s27 + $0x18] sm:$0xff] %v366_v32 }
 0x13a PF: > { %s14_s15 = sadd.s32 1, %s537_s15  }
 0x13b   : > { %p11_p4 = scmp.ge.s32.totalorder %s14_s15, 4  }
 0x13d   :  { %13 = sbr.rel (!%p11_p4) target bundleno = 1 (0x1), region = 66 }

// kernel: graph_unet_forward.9
= control target key start
LH: loop header
LB: loop body
LE: loop exit
PB: predicated region body
PF: predicated region fallthrough
CT: control target
= control target key end

     0   :  { %vm33_vm0 = vcmask 130048   ;;  %s258_s1 = inlined_call_operand.vmem [shape: bf16[16,128], index: 1, kind: input, shape index: {}]   ;;  %s259_s0 = inlined_call_operand.vmem [shape: bf16[16,16], index: 0, kind: input, shape index: {}]   ;;  %s260_s2 = inlined_call_operand.vmem [shape: bf16[128,128], index: 2, kind: input, shape index: {}]   ;;  %s261_s3 = inlined_call_operand.vmem [shape: f32[1,128], index: 3, kind: input, shape index: {}]   ;;  %s262_s4 = inlined_call_operand.vmem [shape: f32[16,128], index: 4, kind: output, shape index: {}]  }
   0x1   :  { %v184_v0 = vld [vmem:[%s258_s1] sm:$0xff]  ;;  %v192_v1 = vld [vmem:[%s260_s2 + $0x38] sm:$0xff]  ;;  %v191_v3 = vld [vmem:[%s260_s2 + $0x30] sm:$0xff] }
   0x2   :  { %v183_v2 = vld [vmem:[%s259_s0] sm:$0xff]  ;;  %44 = vmatpush.bf16.msra.mxu0 %v184_v0  ;;  %120 = vmatpush.bf16.msra.mxu1 %v192_v1  ;;  %v190_v4 = vld [vmem:[%s260_s2 + $0x28] sm:$0xff]  ;;  %v188_v6 = vld [vmem:[%s260_s2 + $0x18] sm:$0xff] }
   0x3   :  { %v189_v5 = vld [vmem:[%s260_s2 + $0x20] sm:$0xff]  ;;  %v187_v7 = vld [vmem:[%s260_s2 + $0x10] sm:$0xff]  ;;  %v186_v8 = vld [vmem:[%s260_s2 + $0x8] sm:$0xff] }
   0x4   :  { %v185_v9 = vld [vmem:[%s260_s2] sm:$0xff] }
   0x5   :  { %150 = vmatmul.msk.bf16.vlgmr.msra.gmra.mxu0 %vm33_vm0, %v183_v2  ;;  %v193_v13 = vld [vmem:[%s261_s3] ss:$0 sm:$0xff] }
   0x6   :  { %121 = vmatpush.bf16.msra.mxu1 %v191_v3 }
   0xa   :  { %122 = vmatpush.bf16.msra.mxu1 %v190_v4 }
   0xe   :  { %123 = vmatpush.bf16.msra.mxu1 %v189_v5 }
  0x12   :  { %124 = vmatpush.bf16.msra.mxu1 %v188_v6 }
  0x16   :  { %125 = vmatpush.bf16.msra.mxu1 %v187_v7 }
  0x1a   :  { %126 = vmatpush.bf16.msra.mxu1 %v186_v8 }
  0x1e   :  { %127 = vmatpush.bf16.msra.mxu1 %v185_v9 }
  0x82   :  { %v46_v10 = vpop.f32.mrf.mxu0 }
  0x8a   :  { %v48_v11 = vpop.f32.mrf.mxu0 }
  0x8b   :  { %v51_v12 = vpack.c.bf16 %v48_v11, %v46_v10 }
  0x8d   :  { %128 = vmatmul.bf16.vlgmr.msra.gmra.mxu1 %v51_v12 }
 0x10a   :  { %v129_v14 = vpop.f32.mrf.mxu1 }
 0x10b   :  { %v130_v15 = vadd.f32 %v193_v13, %v129_v14 }
 0x10d   :  { %v134_v16 = vmax.f32 %v130_v15, 0.0 }
 0x10f   :  { %136 = vst [vmem:[%s262_s4] sm:$0xff] %v134_v16 }
 0x112   :  { %v131_v17 = vpop.f32.mrf.mxu1 }
 0x113   :  { %v132_v18 = vadd.f32 %v193_v13, %v131_v17 }
 0x115   :  { %v135_v19 = vmax.f32 %v132_v18, 0.0 }
 0x117   :  { %137 = vst [vmem:[%s262_s4 + $0x8] sm:$0xff] %v135_v19 }

// kernel: graph_unet_forward.10
= control target key start
LH: loop header
LB: loop body
LE: loop exit
PB: predicated region body
PF: predicated region fallthrough
CT: control target
= control target key end

     0   :  { %vm24_vm0 = vcmask 1043456   ;;  %vm20_vm1 = vcmask 64512   ;;  %s232_s1 = inlined_call_operand.vmem [shape: bf16[8,128], index: 1, kind: input, shape index: {}]   ;;  %s233_s0 = inlined_call_operand.vmem [shape: bf16[8,8], index: 0, kind: input, shape index: {}]   ;;  %s234_s2 = inlined_call_operand.vmem [shape: bf16[128,128], index: 2, kind: input, shape index: {}]   ;;  %s235_s3 = inlined_call_operand.vmem [shape: f32[1,128], index: 3, kind: input, shape index: {}]   ;;  %s236_s4 = inlined_call_operand.vmem [shape: f32[8,128], index: 4, kind: output, shape index: {}]  }
   0x1   :  { %v19_v0 = vld [vmem:[%s232_s1] sm:$0xf]  ;;  %v169_v1 = vld [vmem:[%s234_s2 + $0x38] sm:$0xff]  ;;  %v168_v4 = vld [vmem:[%s234_s2 + $0x30] sm:$0xff] }
   0x2   :  { %v26_v2 = vsel %vm24_vm0, %v19_v0, 0  ;;  %v18_v3 = vld [vmem:[%s233_s0] sm:$0xf]  ;;  %110 = vmatpush.bf16.msra.mxu1 %v169_v1  ;;  %v167_v5 = vld [vmem:[%s234_s2 + $0x28] sm:$0xff]  ;;  %v165_v7 = vld [vmem:[%s234_s2 + $0x18] sm:$0xff] }
   0x3   :  { %35 = vmatpush.bf16.msra.mxu0 %v26_v2  ;;  %v166_v6 = vld [vmem:[%s234_s2 + $0x20] sm:$0xff]  ;;  %v164_v8 = vld [vmem:[%s234_s2 + $0x10] sm:$0xff]  ;;  %v163_v9 = vld [vmem:[%s234_s2 + $0x8] sm:$0xff] }
   0x4   :  { %v162_v10 = vld [vmem:[%s234_s2] sm:$0xff] }
   0x5   :  { %v170_v14 = vld [vmem:[%s235_s3] ss:$0 sm:$0xff] }
   0x6   :  { %129 = vmatmul.msk.bf16.vlgmr.msra.gmra.mxu0 %vm20_vm1, %v18_v3  ;;  %111 = vmatpush.bf16.msra.mxu1 %v168_v4 }
   0xa   :  { %112 = vmatpush.bf16.msra.mxu1 %v167_v5 }
   0xe   :  { %113 = vmatpush.bf16.msra.mxu1 %v166_v6 }
  0x12   :  { %114 = vmatpush.bf16.msra.mxu1 %v165_v7 }
  0x16   :  { %115 = vmatpush.bf16.msra.mxu1 %v164_v8 }
  0x1a   :  { %116 = vmatpush.bf16.msra.mxu1 %v163_v9 }
  0x1e   :  { %117 = vmatpush.bf16.msra.mxu1 %v162_v10 }
  0x83   :  { %v37_v11 = vpop.f32.mrf.mxu0 }
  0x84   :  { %v41_v12 = vpack.c.bf16 %v37_v11, %v37_v11 }
  0x86   :  { %118 = vmatmul.bf16.vlgmr.msra.gmra.mxu1 %v41_v12 }
  0x8b   :  { %v39_v13 = vpop.f32.mrf.mxu0 }
 0x103   :  { %v119_v15 = vpop.f32.mrf.mxu1 }
 0x104   :  { %v120_v16 = vadd.f32 %v170_v14, %v119_v15 }
 0x106   :  { %v123_v17 = vmax.f32 %v120_v16, 0.0 }
 0x108   :  { %124 = vst [vmem:[%s236_s4] sm:$0xff] %v123_v17 }
 0x10b   :  { %v121_v18 = vpop.f32.mrf.mxu1 }

// kernel: graph_unet_forward.13
= control target key start
LH: loop header
LB: loop body
LE: loop exit
PB: predicated region body
PF: predicated region fallthrough
CT: control target
= control target key end

     0   :  { %s627_s15 = smov 0   ;;  %s695_s0 = inlined_call_operand.vmem [shape: bf16[64,64], index: 0, kind: input, shape index: {}]   ;;  %s696_s1 = inlined_call_operand.vmem [shape: bf16[64,128], index: 1, kind: input, shape index: {}]   ;;  %s697_s2 = inlined_call_operand.vmem [shape: bf16[128,128], index: 2, kind: input, shape index: {}]   ;;  %s698_s3 = inlined_call_operand.vmem [shape: f32[1,128], index: 3, kind: input, shape index: {}]   ;;  %s699_s4 = inlined_call_operand.vmem [shape: f32[64,128], index: 4, kind: output, shape index: {}]  }
   0x1 LB: > { %s474_s16 = sadd.s32 4294967295, %s600_s15   ;;  %p478_p0 = scmp.ge.s32.totalorder %s600_s15, 1  ;;  %s600_s15 = sphi %s627_s15, %s14_s15  }
   0x2   : > { %p163_p1 = scmp.lt.s32.totalorder %s600_s15, 3 }
   0x4   : > { %p164_p2 = pnand %p478_p0, %p163_p1 }
   0x5   : > { %s479_s19 = sshll.u32 (!%p164_p2), %s474_s16, 2 }
   0x6   : > { %167 = sbr.rel (%p164_p2) target bundleno = 568 (0x238), region = 36  ;;  %p190_p3 = scmp.lt.s32.totalorder (!%p164_p2), %s479_s19, 7 }
   0xb   : > { %v548_v0 = vld [vmem:[%s696_s1 + $0x18] sm:$0xff]  ;;  %v547_v2 = vld [vmem:[%s696_s1 + $0x10] sm:$0xff]  ;;  %s701_s19 = smov (!%p190_p3, %s479_s19), 7  ;;  %v546_v4 = vld [vmem:[%s696_s1 + $0x8] sm:$0xff]  ;;  %vm248_vm0 = vcmask 523264   ;;  %v363_v20 = vlaneseq }
   0xc   : > { %v556_v1 = vld [vmem:[%s697_s2 + $0x38] sm:$0xff]  ;;  %259 = vmatpush.bf16.msra.mxu0 %v548_v0  ;;  %557 = vmatpush.bf16.msra.mxu3 %v548_v0  ;;  %v555_v3 = vld [vmem:[%s697_s2 + $0x30] sm:$0xff]  ;;  %s480_s28 = sshll.u32 %s701_s19, 2  ;;  %v554_v5 = vld [vmem:[%s697_s2 + $0x28] sm:$0xff]  ;;  %s482_s24 = sshll.u32 %s701_s19, 3 }
   0xd   : > { %344 = vmatpush.bf16.msra.mxu1 %v556_v1  ;;  %561 = vmatpush.bf16.msra.mxu2 %v556_v1  ;;  %v545_v6 = vld [vmem:[%s696_s1] sm:$0xff]  ;;  %s193_s9 = scalar_lea.vmem %s695_s0, %s480_s28  ;;  %v552_v10 = vld [vmem:[%s697_s2 + $0x18] sm:$0xff]  ;;  %v551_v11 = vld [vmem:[%s697_s2 + $0x10] sm:$0xff]  ;;  %v364_v21 = vand.u32 127, %v363_v20  ;;  %s199_s27 = scalar_lea.vmem %s699_s4, %s482_s24 }
   0xe   : > { %v553_v7 = vld [vmem:[%s697_s2 + $0x20] sm:$0xff]  ;;  %v544_v9 = vld [vmem:[%s193_s9 + $0x8] sm:$0xff] }
   0xf   : > { %v543_v8 = vld [vmem:[%s193_s9] sm:$0xff]  ;;  %v550_v12 = vld [vmem:[%s697_s2 + $0x8] sm:$0xff]  ;;  %vm365_vm1 = vcmp.lt.s32.totalorder %v364_v21, 8 }
  0x10   : > { %260 = vmatpush.bf16.msra.mxu0 %v547_v2  ;;  %558 = vmatpush.bf16.msra.mxu3 %v547_v2  ;;  %v549_v13 = vld [vmem:[%s697_s2] sm:$0xff] }
  0x11   : > { %345 = vmatpush.bf16.msra.mxu1 %v555_v3  ;;  %562 = vmatpush.bf16.msra.mxu2 %v555_v3  ;;  %v577_v22 = vld [vmem:[%s698_s3] ss:$0 sm:$0xff] }
  0x14   : > { %261 = vmatpush.bf16.msra.mxu0 %v546_v4  ;;  %559 = vmatpush.bf16.msra.mxu3 %v546_v4 }
  0x15   : > { %346 = vmatpush.bf16.msra.mxu1 %v554_v5  ;;  %563 = vmatpush.bf16.msra.mxu2 %v554_v5 }
  0x18   : > { %262 = vmatpush.bf16.msra.mxu0 %v545_v6  ;;  %560 = vmatpush.bf16.msra.mxu3 %v545_v6 }
  0x19   : > { %347 = vmatpush.bf16.msra.mxu1 %v553_v7  ;;  %564 = vmatpush.bf16.msra.mxu2 %v553_v7 }
  0x1b   : > { %507 = vmatmul.msk.bf16.vlgmr.msra.gmra.mxu0 %vm248_vm0, %v543_v8  ;;  %508 = vmatmul.msk.bf16.vlgmr.msra.gmra.mxu3 %vm248_vm0, %v544_v9 }
  0x1d   : > { %348 = vmatpush.bf16.msra.mxu1 %v552_v10  ;;  %565 = vmatpush.bf16.msra.mxu2 %v552_v10 }
  0x21   : > { %349 = vmatpush.bf16.msra.mxu1 %v551_v11  ;;  %566 = vmatpush.bf16.msra.mxu2 %v551_v11 }
  0x25   : > { %350 = vmatpush.bf16.msra.mxu1 %v550_v12  ;;  %567 = vmatpush.bf16.msra.mxu2 %v550_v12 }
  0x29   : > { %351 = vmatpush.bf16.msra.mxu1 %v549_v13  ;;  %568 = vmatpush.bf16.msra.mxu2 %v549_v13 }
  0x98   : > { %v264_v14 = vpop.f32.mrf.mxu0 }
  0x9e   : > { %v269_v15 = vpop.f32.mrf.mxu3 }
  0xa0   : > { %v266_v16 = vpop.f32.mrf.mxu0 }
  0xa1   : > { %v274_v17 = vpack.c.bf16 %v266_v16, %v264_v14 }
  0xa3   : > { %352 = vmatmul.bf16.vlgmr.msra.gmra.mxu1 %v274_v17 }
  0xa6   : > { %v271_v18 = vpop.f32.mrf.mxu3 }
  0xa7   : > { %v275_v19 = vpack.c.bf16 %v271_v18, %v269_v15 }
  0xa9   : > { %357 = vmatmul.bf16.vlgmr.msra.gmra.mxu2 %v275_v19 }
 0x120   : > { %v353_v23 = vpop.f32.mrf.mxu1 }
 0x121   : > { %v354_v24 = vadd.f32 %v577_v22, %v353_v23 }
 0x123   : > { %v366_v25 = vsel %vm365_vm1, %v354_v24, -inf }
 0x124   : > { %370 = vmax.xlane.f32.xlu0 %v366_v25 }
 0x128   : > { %v355_v26 = vpop.f32.mrf.mxu1 }
 0x129   : > { %v356_v27 = vadd.f32 %v577_v22, %v355_v26 }
 0x12b   : > { %v367_v28 = vsel %vm365_vm1, %v356_v27, -inf }
 0x12c   : > { %v358_v29 = vpop.f32.mrf.mxu2  ;;  %372 = vmax.xlane.f32.xlu0 %v367_v28 }
 0x12d   : > { %v359_v30 = vadd.f32 %v577_v22, %v358_v29 }
 0x12f   : > { %v368_v31 = vsel %vm365_vm1, %v359_v30, -inf }
 0x130   : > { %374 = vmax.xlane.f32.xlu1 %v368_v31 }
 0x134   : > { %v360_v32 = vpop.f32.mrf.mxu2 }
 0x135   : > { %v361_v33 = vadd.f32 %v577_v22, %v360_v32 }
 0x137   : > { %v369_v34 = vsel %vm365_vm1, %v361_v33, -inf }
 0x138   : > { %376 = vmax.xlane.f32.xlu1 %v369_v34 }
 0x197   : > { %v371_v35 = vpop.xlane.xlu0 %370 }
 0x198   : > { %v378_v36 = vsub.f32 %v354_v24, %v371_v35 }
 0x19a   : > { %v382_v37 = vmul.f32 1.442695, %v378_v36 }
 0x19c   : > { %578 = vpow2.f32 %v382_v37 }
 0x19f   : > { %v373_v38 = vpop.xlane.xlu0 %372 }
 0x1a0   : > { %v379_v39 = vsub.f32 %v356_v27, %v373_v38 }
 0x1a2   : > { %v579_v40 = vpop.eup %578  ;;  %v384_v41 = vmul.f32 1.442695, %v379_v39 }
 0x1a3   : > { %v375_v42 = vpop.xlane.xlu1 %374  ;;  %v390_v43 = vsel %vm365_vm1, %v579_v40, 0.0 }
 0x1a4   : > { %580 = vpow2.f32 %v384_v41  ;;  %v380_v44 = vsub.f32 %v359_v30, %v375_v42  ;;  %394 = vadd.xlane.f32.xlu2 %v390_v43 }
 0x1a6   : > { %v386_v45 = vmul.f32 1.442695, %v380_v44 }
 0x1a8   : > { %582 = vpow2.f32 %v386_v45 }
 0x1aa   : > { %v581_v46 = vpop.eup %580 }
 0x1ab   : > { %v377_v47 = vpop.xlane.xlu1 %376  ;;  %v391_v48 = vsel %vm365_vm1, %v581_v46, 0.0 }
 0x1ac   : > { %v381_v49 = vsub.f32 %v361_v33, %v377_v47  ;;  %396 = vadd.xlane.f32.xlu2 %v391_v48 }
 0x1ae   : > { %v583_v50 = vpop.eup %582  ;;  %v388_v51 = vmul.f32 1.442695, %v381_v49 }
 0x1af   : > { %v392_v52 = vsel %vm365_vm1, %v583_v50, 0.0 }
 0x1b0   : > { %584 = vpow2.f32 %v388_v51  ;;  %398 = vadd.xlane.f32.xlu0 %v392_v52 }
 0x1b6   : > { %v585_v53 = vpop.eup %584 }
 0x1b7   : > { %v393_v54 = vsel %vm365_vm1, %v585_v53, 0.0 }
 0x1b8   : > { %400 = vadd.xlane.f32.xlu1 %v393_v54 }
 0x217   : > { %v395_v55 = vpop.xlane.xlu2 %394 }
 0x218   : > { %586 = vlog2.f32 %v395_v55 }
 0x21e   : > { %v587_v56 = vpop.eup %586 }
 0x21f   : > { %v403_v57 = vmul.f32 0.6931472, %v587_v56  ;;  %v397_v58 = vpop.xlane.xlu2 %396 }
 0x220   : > { %588 = vlog2.f32 %v397_v58 }
 0x221   : > { %v410_v59 = vsub.f32 %v378_v36, %v403_v57 }
 0x223   : > { %414 = vst [vmem:[%s199_s27] sm:$0xff] %v410_v59  ;;  %v399_v60 = vpop.xlane.xlu0 %398 }
 0x224   : > { %590 = vlog2.f32 %v399_v60 }
 0x226   : > { %v589_v61 = vpop.eup %588 }
 0x227   : > { %v405_v62 = vmul.f32 0.6931472, %v589_v61 }
 0x229   : > { %v411_v63 = vsub.f32 %v379_v39, %v405_v62 }
 0x22a   : > { %v591_v0 = vpop.eup %590 }
 0x22b   : > { %415 = vst [vmem:[%s199_s27 + $0x8] sm:$0xff] %v411_v63  ;;  %v407_v1 = vmul.f32 0.6931472, %v591_v0  ;;  %v401_v2 = vpop.xlane.xlu1 %400 }
 0x22c   : > { %592 = vlog2.f32 %v401_v2 }
 0x22d   : > { %v412_v3 = vsub.f32 %v380_v44, %v407_v1 }
 0x22f   : > { %416 = vst [vmem:[%s199_s27 + $0x10] sm:$0xff] %v412_v3 }
 0x232   : > { %v593_v4 = vpop.eup %592 }
 0x233   : > { %v409_v5 = vmul.f32 0.6931472, %v593_v4 }
 0x235   : > { %v413_v6 = vsub.f32 %v381_v49, %v409_v5 }
 0x237   : > { %417 = vst [vmem:[%s199_s27 + $0x18] sm:$0xff] %v413_v6 }
 0x238 PF: > { %s14_s15 = sadd.s32 1, %s600_s15  }
 0x239   : > { %p11_p4 = scmp.ge.s32.totalorder %s14_s15, 4  }
 0x23b   :  { %13 = sbr.rel (!%p11_p4) target bundleno = 1 (0x1), region = 66 }

</bundles_post_ra>
